<compile_context>
chip_gen: v7x
topology: tpu7x:2x2x1
jax: 0.10.0
libtpu: 0.0.40
codegen_flags: <defaults>
</compile_context>

<pallas_src>
import jax
import jax.numpy as jnp
from jax.experimental import pallas as pl
from jax.experimental.pallas import tpu as pltpu

# KarateClub-like sizes implied by the module's __init__
NUM_FEATURES = 34   # dataset.num_features
NUM_CLASSES = 4     # dataset.num_classes
N_NODES = 34

H1, H2, H3 = 4, 4, 2          # conv1/conv2/conv3 output widths
OUT_WIDTH = H3 + NUM_CLASSES  # [emb | logits], fully written -> no stale lanes

# ---- single packed-input slab layout (all static offsets) -------------------
# lanes:
L_A = 0                          # A_hat         rows 0:34, lanes  0:34
L_X = L_A + N_NODES              # X             rows 0:34, lanes 34:68
L_W1 = L_X + NUM_FEATURES        # W1 (34,4)     rows 0:34, lanes 68:72
L_P = L_W1 + H1                  # small-param column, lanes 72:76
SLAB_LANES = L_P + 4             # 76
SLAB_ROWS = max(N_NODES, NUM_FEATURES)   # 34

# rows inside the small-param column (lanes L_P:L_P+4)
R_B1 = 0                         # b1 (1,4)
R_W2 = R_B1 + 1                  # w2 (4,4)
R_B2 = R_W2 + H1                 # b2 (1,4)
R_W3 = R_B2 + 1                  # w3 (4,2)
R_B3 = R_W3 + H2                 # b3 (1,2)
R_WC = R_B3 + 1                  # wc (2,4)
R_BC = R_WC + H3                 # bc (1,4)
assert R_BC + 1 <= SLAB_ROWS


def _gcn_kernel(s_ref, out_ref):
    # Static slices into the single packed slab (one input DMA for everything).
    a = s_ref[:, L_A:L_A + N_NODES]                     # (34, 34)
    x = s_ref[:, L_X:L_X + NUM_FEATURES]                # (34, 34)
    w1 = s_ref[0:NUM_FEATURES, L_W1:L_W1 + H1]          # (34, 4)
    b1 = s_ref[R_B1:R_B1 + 1, L_P:L_P + H1]             # (1, 4)
    w2 = s_ref[R_W2:R_W2 + H1, L_P:L_P + H2]            # (4, 4)
    b2 = s_ref[R_B2:R_B2 + 1, L_P:L_P + H2]             # (1, 4)
    w3 = s_ref[R_W3:R_W3 + H2, L_P:L_P + H3]            # (4, 2)
    b3 = s_ref[R_B3:R_B3 + 1, L_P:L_P + H3]             # (1, 2)
    wc = s_ref[R_WC:R_WC + H3, L_P:L_P + NUM_CLASSES]   # (2, 4)
    bc = s_ref[R_BC:R_BC + 1, L_P:L_P + NUM_CLASSES]    # (1, 4)

    def small_matmul(h, w):
        # K <= 4 and static: unrolled VPU broadcast-multiply-add keeps these
        # tiny matmuls off the MXU push/pop latency chain.
        k_dim = w.shape[0]
        acc = h[:, 0:1] * w[0:1, :]
        for k in range(1, k_dim):
            acc = acc + h[:, k:k + 1] * w[k:k + 1, :]
        return acc

    # conv1: K = NUM_FEATURES -> both matmuls on the MXU.
    hw = jnp.dot(x, w1, preferred_element_type=jnp.float32)             # (N, 4)
    h = jnp.tanh(jnp.dot(a, hw, preferred_element_type=jnp.float32) + b1)

    # conv2: feature matmul on the VPU, aggregation (K=34) on the MXU.
    h = jnp.tanh(jnp.dot(a, small_matmul(h, w2),
                         preferred_element_type=jnp.float32) + b2)

    # conv3
    h = jnp.tanh(jnp.dot(a, small_matmul(h, w3),
                         preferred_element_type=jnp.float32) + b3)      # (N, 2)

    # classifier (Linear, K=2) on the VPU.
    logits = small_matmul(h, wc) + bc                                   # (N, 4)

    # Two sliced stores into the single output tile (no lane concat / pad).
    out_ref[:, 0:H3] = h
    out_ref[:, H3:H3 + NUM_CLASSES] = logits


def pack_inputs(a_hat, x, params):
    """Pack A_hat, X and all parameters into one f32 slab (one input DMA)."""
    w1, b1, w2, b2, w3, b3, wc, bc = params
    slab = jnp.zeros((SLAB_ROWS, SLAB_LANES), jnp.float32)
    slab = slab.at[0:N_NODES, L_A:L_A + N_NODES].set(a_hat)
    slab = slab.at[0:N_NODES, L_X:L_X + NUM_FEATURES].set(x)
    slab = slab.at[0:NUM_FEATURES, L_W1:L_W1 + H1].set(w1)
    slab = slab.at[R_B1:R_B1 + 1, L_P:L_P + H1].set(b1)
    slab = slab.at[R_W2:R_W2 + H1, L_P:L_P + H2].set(w2)
    slab = slab.at[R_B2:R_B2 + 1, L_P:L_P + H2].set(b2)
    slab = slab.at[R_W3:R_W3 + H2, L_P:L_P + H3].set(w3)
    slab = slab.at[R_B3:R_B3 + 1, L_P:L_P + H3].set(b3)
    slab = slab.at[R_WC:R_WC + H3, L_P:L_P + NUM_CLASSES].set(wc)
    slab = slab.at[R_BC:R_BC + 1, L_P:L_P + NUM_CLASSES].set(bc)
    return slab


def _cost_estimate():
    n, f = N_NODES, NUM_FEATURES
    flops = 2 * (n * f * H1 + n * n * H1        # conv1: X@W1, A@(.)
                 + n * H1 * H2 + n * n * H2     # conv2
                 + n * H2 * H3 + n * n * H3     # conv3
                 + n * H3 * NUM_CLASSES)        # classifier
    transcendentals = n * (H1 + H2 + H3)        # three tanh layers
    bytes_accessed = SLAB_ROWS * SLAB_LANES * 4 + N_NODES * OUT_WIDTH * 4
    return pl.CostEstimate(flops=flops, transcendentals=transcendentals,
                           bytes_accessed=bytes_accessed)


def gcn_forward(a_hat, x, params):
    slab = pack_inputs(a_hat, x, params)
    vmem = lambda: pl.BlockSpec(memory_space=pltpu.MemorySpace.VMEM)
    combined = pl.pallas_call(
        _gcn_kernel,
        out_shape=jax.ShapeDtypeStruct((N_NODES, OUT_WIDTH), jnp.float32),
        in_specs=[vmem()],
        out_specs=vmem(),
        cost_estimate=_cost_estimate(),
    )(slab)
    emb = combined[:, 0:H3]                        # tanh(conv3) embedding ("x")
    logits = combined[:, H3:H3 + NUM_CLASSES]      # classifier output ("result")
    return logits, emb


def build_a_hat(edge_index, n):
    """Dense D^-1/2 (A + I) D^-1/2, matching PyG GCNConv's gcn_norm."""
    src, dst = edge_index
    a = jnp.zeros((n, n), jnp.float32).at[dst, src].add(1.0)
    a = a + jnp.eye(n, dtype=jnp.float32)   # add self-loops
    deg = a.sum(axis=1)
    dinv = jnp.where(deg > 0, 1.0 / jnp.sqrt(deg), 0.0)
    return dinv[:, None] * a * dinv[None, :]


def init_params(key):
    """Deterministic synthetic parameter init (shapes from the module's __init__)."""
    dims = [(NUM_FEATURES, H1), (H1, H2), (H2, H3), (H3, NUM_CLASSES)]
    params = []
    for (fan_in, fan_out) in dims:
        key, kw = jax.random.split(key)
        scale = jnp.sqrt(6.0 / (fan_in + fan_out))
        w = jax.random.uniform(kw, (fan_in, fan_out), jnp.float32, -scale, scale)
        b = jnp.zeros((1, fan_out), jnp.float32)   # kept 2-D for clean TPU broadcast
        params += [w, b]
    return tuple(params)


def reference_forward(a_hat, x, params):
    w1, b1, w2, b2, w3, b3, wc, bc = params
    h = jnp.tanh(a_hat @ (x @ w1) + b1)
    h = jnp.tanh(a_hat @ (h @ w2) + b2)
    h = jnp.tanh(a_hat @ (h @ w3) + b3)
    return h @ wc + bc, h


if __name__ == "__main__":
    key = jax.random.PRNGKey(0)
    k_x, k_p = jax.random.split(key)

    # Deterministic small graph: undirected ring over N_NODES (edges both directions).
    idx = jnp.arange(N_NODES)
    nxt = (idx + 1) % N_NODES
    src = jnp.concatenate([idx, nxt])
    dst = jnp.concatenate([nxt, idx])
    edge_index = jnp.stack([src, dst])             # (2, 2*N_NODES)

    x = jax.random.normal(k_x, (N_NODES, NUM_FEATURES), jnp.float32)
    params = init_params(k_p)
    a_hat = build_a_hat(edge_index, N_NODES)

    result, emb = gcn_forward(a_hat, x, params)
    result, emb = jax.block_until_ready((result, emb))

    ref_result, ref_emb = reference_forward(a_hat, x, params)
    assert result.shape == (N_NODES, NUM_CLASSES)
    assert emb.shape == (N_NODES, H3)
    assert jnp.allclose(result, ref_result, atol=1e-5, rtol=1e-5)
    assert jnp.allclose(emb, ref_emb, atol=1e-5, rtol=1e-5)

    print("KERNEL_OK")
</pallas_src>

<mosaic_0001>
module attributes {stable_mosaic.version = 11 : i64} {
  func.func @_gcn_kernel(%arg0: memref<34x76xf32, #tpu.memory_space<vmem>>, %arg1: memref<34x6xf32, #tpu.memory_space<vmem>>) attributes {dimension_semantics = [], scalar_prefetch = 0 : i64, scratch_operands = 0 : i64, tpu.core_type = #tpu.core_type<tc>} {
    %c0 = arith.constant 0 : index
    %c0_0 = arith.constant 0 : index
    %0 = vector.load %arg0[%c0, %c0_0] : memref<34x76xf32, #tpu.memory_space<vmem>>, vector<34x34xf32>
    %c0_1 = arith.constant 0 : index
    %c34 = arith.constant 34 : index
    %1 = vector.load %arg0[%c0_1, %c34] : memref<34x76xf32, #tpu.memory_space<vmem>>, vector<34x34xf32>
    %c0_2 = arith.constant 0 : index
    %c68 = arith.constant 68 : index
    %2 = vector.load %arg0[%c0_2, %c68] : memref<34x76xf32, #tpu.memory_space<vmem>>, vector<34x4xf32>
    %c0_3 = arith.constant 0 : index
    %c72 = arith.constant 72 : index
    %3 = vector.load %arg0[%c0_3, %c72] : memref<34x76xf32, #tpu.memory_space<vmem>>, vector<1x4xf32>
    %c1 = arith.constant 1 : index
    %c72_4 = arith.constant 72 : index
    %4 = vector.load %arg0[%c1, %c72_4] : memref<34x76xf32, #tpu.memory_space<vmem>>, vector<4x4xf32>
    %c5 = arith.constant 5 : index
    %c72_5 = arith.constant 72 : index
    %5 = vector.load %arg0[%c5, %c72_5] : memref<34x76xf32, #tpu.memory_space<vmem>>, vector<1x4xf32>
    %c6 = arith.constant 6 : index
    %c72_6 = arith.constant 72 : index
    %6 = vector.load %arg0[%c6, %c72_6] : memref<34x76xf32, #tpu.memory_space<vmem>>, vector<4x2xf32>
    %c10 = arith.constant 10 : index
    %c72_7 = arith.constant 72 : index
    %7 = vector.load %arg0[%c10, %c72_7] : memref<34x76xf32, #tpu.memory_space<vmem>>, vector<1x2xf32>
    %c11 = arith.constant 11 : index
    %c72_8 = arith.constant 72 : index
    %8 = vector.load %arg0[%c11, %c72_8] : memref<34x76xf32, #tpu.memory_space<vmem>>, vector<2x4xf32>
    %c13 = arith.constant 13 : index
    %c72_9 = arith.constant 72 : index
    %9 = vector.load %arg0[%c13, %c72_9] : memref<34x76xf32, #tpu.memory_space<vmem>>, vector<1x4xf32>
    %cst = arith.constant dense<0.000000e+00> : vector<34x4xf32>
    %10 = tpu.matmul %1, %2, %cst {dimension_numbers = #tpu.dot_dimension_numbers<[1], [0], [0], [1], [0, 0, 1, 1], [], []>} : vector<34x34xf32>, vector<34x4xf32>, vector<34x4xf32> -> vector<34x4xf32>
    %cst_10 = arith.constant dense<0.000000e+00> : vector<34x4xf32>
    %11 = tpu.matmul %0, %10, %cst_10 {dimension_numbers = #tpu.dot_dimension_numbers<[1], [0], [0], [1], [0, 0, 1, 1], [], []>} : vector<34x34xf32>, vector<34x4xf32>, vector<34x4xf32> -> vector<34x4xf32>
    %12 = vector.broadcast %3 : vector<1x4xf32> to vector<34x4xf32>
    %13 = arith.addf %11, %12 : vector<34x4xf32>
    %14 = math.tanh %13 : vector<34x4xf32>
    %15 = vector.extract_strided_slice %14 {offsets = [0, 0], sizes = [34, 1], strides = [1, 1]} : vector<34x4xf32> to vector<34x1xf32>
    %16 = vector.extract_strided_slice %4 {offsets = [0, 0], sizes = [1, 4], strides = [1, 1]} : vector<4x4xf32> to vector<1x4xf32>
    %17 = vector.broadcast %15 : vector<34x1xf32> to vector<34x4xf32>
    %18 = vector.broadcast %16 : vector<1x4xf32> to vector<34x4xf32>
    %19 = arith.mulf %17, %18 : vector<34x4xf32>
    %20 = vector.extract_strided_slice %14 {offsets = [0, 1], sizes = [34, 1], strides = [1, 1]} : vector<34x4xf32> to vector<34x1xf32>
    %21 = vector.extract_strided_slice %4 {offsets = [1, 0], sizes = [1, 4], strides = [1, 1]} : vector<4x4xf32> to vector<1x4xf32>
    %22 = vector.broadcast %20 : vector<34x1xf32> to vector<34x4xf32>
    %23 = vector.broadcast %21 : vector<1x4xf32> to vector<34x4xf32>
    %24 = arith.mulf %22, %23 : vector<34x4xf32>
    %25 = arith.addf %19, %24 : vector<34x4xf32>
    %26 = vector.extract_strided_slice %14 {offsets = [0, 2], sizes = [34, 1], strides = [1, 1]} : vector<34x4xf32> to vector<34x1xf32>
    %27 = vector.extract_strided_slice %4 {offsets = [2, 0], sizes = [1, 4], strides = [1, 1]} : vector<4x4xf32> to vector<1x4xf32>
    %28 = vector.broadcast %26 : vector<34x1xf32> to vector<34x4xf32>
    %29 = vector.broadcast %27 : vector<1x4xf32> to vector<34x4xf32>
    %30 = arith.mulf %28, %29 : vector<34x4xf32>
    %31 = arith.addf %25, %30 : vector<34x4xf32>
    %32 = vector.extract_strided_slice %14 {offsets = [0, 3], sizes = [34, 1], strides = [1, 1]} : vector<34x4xf32> to vector<34x1xf32>
    %33 = vector.extract_strided_slice %4 {offsets = [3, 0], sizes = [1, 4], strides = [1, 1]} : vector<4x4xf32> to vector<1x4xf32>
    %34 = vector.broadcast %32 : vector<34x1xf32> to vector<34x4xf32>
    %35 = vector.broadcast %33 : vector<1x4xf32> to vector<34x4xf32>
    %36 = arith.mulf %34, %35 : vector<34x4xf32>
    %37 = arith.addf %31, %36 : vector<34x4xf32>
    %cst_11 = arith.constant dense<0.000000e+00> : vector<34x4xf32>
    %38 = tpu.matmul %0, %37, %cst_11 {dimension_numbers = #tpu.dot_dimension_numbers<[1], [0], [0], [1], [0, 0, 1, 1], [], []>} : vector<34x34xf32>, vector<34x4xf32>, vector<34x4xf32> -> vector<34x4xf32>
    %39 = vector.broadcast %5 : vector<1x4xf32> to vector<34x4xf32>
    %40 = arith.addf %38, %39 : vector<34x4xf32>
    %41 = math.tanh %40 : vector<34x4xf32>
    %42 = vector.extract_strided_slice %41 {offsets = [0, 0], sizes = [34, 1], strides = [1, 1]} : vector<34x4xf32> to vector<34x1xf32>
    %43 = vector.extract_strided_slice %6 {offsets = [0, 0], sizes = [1, 2], strides = [1, 1]} : vector<4x2xf32> to vector<1x2xf32>
    %44 = vector.broadcast %42 : vector<34x1xf32> to vector<34x2xf32>
    %45 = vector.broadcast %43 : vector<1x2xf32> to vector<34x2xf32>
    %46 = arith.mulf %44, %45 : vector<34x2xf32>
    %47 = vector.extract_strided_slice %41 {offsets = [0, 1], sizes = [34, 1], strides = [1, 1]} : vector<34x4xf32> to vector<34x1xf32>
    %48 = vector.extract_strided_slice %6 {offsets = [1, 0], sizes = [1, 2], strides = [1, 1]} : vector<4x2xf32> to vector<1x2xf32>
    %49 = vector.broadcast %47 : vector<34x1xf32> to vector<34x2xf32>
    %50 = vector.broadcast %48 : vector<1x2xf32> to vector<34x2xf32>
    %51 = arith.mulf %49, %50 : vector<34x2xf32>
    %52 = arith.addf %46, %51 : vector<34x2xf32>
    %53 = vector.extract_strided_slice %41 {offsets = [0, 2], sizes = [34, 1], strides = [1, 1]} : vector<34x4xf32> to vector<34x1xf32>
    %54 = vector.extract_strided_slice %6 {offsets = [2, 0], sizes = [1, 2], strides = [1, 1]} : vector<4x2xf32> to vector<1x2xf32>
    %55 = vector.broadcast %53 : vector<34x1xf32> to vector<34x2xf32>
    %56 = vector.broadcast %54 : vector<1x2xf32> to vector<34x2xf32>
    %57 = arith.mulf %55, %56 : vector<34x2xf32>
    %58 = arith.addf %52, %57 : vector<34x2xf32>
    %59 = vector.extract_strided_slice %41 {offsets = [0, 3], sizes = [34, 1], strides = [1, 1]} : vector<34x4xf32> to vector<34x1xf32>
    %60 = vector.extract_strided_slice %6 {offsets = [3, 0], sizes = [1, 2], strides = [1, 1]} : vector<4x2xf32> to vector<1x2xf32>
    %61 = vector.broadcast %59 : vector<34x1xf32> to vector<34x2xf32>
    %62 = vector.broadcast %60 : vector<1x2xf32> to vector<34x2xf32>
    %63 = arith.mulf %61, %62 : vector<34x2xf32>
    %64 = arith.addf %58, %63 : vector<34x2xf32>
    %cst_12 = arith.constant dense<0.000000e+00> : vector<34x2xf32>
    %65 = tpu.matmul %0, %64, %cst_12 {dimension_numbers = #tpu.dot_dimension_numbers<[1], [0], [0], [1], [0, 0, 1, 1], [], []>} : vector<34x34xf32>, vector<34x2xf32>, vector<34x2xf32> -> vector<34x2xf32>
    %66 = vector.broadcast %7 : vector<1x2xf32> to vector<34x2xf32>
    %67 = arith.addf %65, %66 : vector<34x2xf32>
    %68 = math.tanh %67 : vector<34x2xf32>
    %69 = vector.extract_strided_slice %68 {offsets = [0, 0], sizes = [34, 1], strides = [1, 1]} : vector<34x2xf32> to vector<34x1xf32>
    %70 = vector.extract_strided_slice %8 {offsets = [0, 0], sizes = [1, 4], strides = [1, 1]} : vector<2x4xf32> to vector<1x4xf32>
    %71 = vector.broadcast %69 : vector<34x1xf32> to vector<34x4xf32>
    %72 = vector.broadcast %70 : vector<1x4xf32> to vector<34x4xf32>
    %73 = arith.mulf %71, %72 : vector<34x4xf32>
    %74 = vector.extract_strided_slice %68 {offsets = [0, 1], sizes = [34, 1], strides = [1, 1]} : vector<34x2xf32> to vector<34x1xf32>
    %75 = vector.extract_strided_slice %8 {offsets = [1, 0], sizes = [1, 4], strides = [1, 1]} : vector<2x4xf32> to vector<1x4xf32>
    %76 = vector.broadcast %74 : vector<34x1xf32> to vector<34x4xf32>
    %77 = vector.broadcast %75 : vector<1x4xf32> to vector<34x4xf32>
    %78 = arith.mulf %76, %77 : vector<34x4xf32>
    %79 = arith.addf %73, %78 : vector<34x4xf32>
    %80 = vector.broadcast %9 : vector<1x4xf32> to vector<34x4xf32>
    %81 = arith.addf %79, %80 : vector<34x4xf32>
    %c0_13 = arith.constant 0 : index
    %c0_14 = arith.constant 0 : index
    %82 = vector.load %arg1[%c0_13, %c0_14] : memref<34x6xf32, #tpu.memory_space<vmem>>, vector<34x2xf32>
    tpu.vector_store %arg1[%c0_13, %c0_14], %68 {strides = array<i32>} : memref<34x6xf32, #tpu.memory_space<vmem>>, vector<34x2xf32>,
    %c0_15 = arith.constant 0 : index
    %c2 = arith.constant 2 : index
    %83 = vector.load %arg1[%c0_15, %c2] : memref<34x6xf32, #tpu.memory_space<vmem>>, vector<34x4xf32>
    tpu.vector_store %arg1[%c0_15, %c2], %81 {strides = array<i32>} : memref<34x6xf32, #tpu.memory_space<vmem>>, vector<34x4xf32>,
    return
  }
}

</mosaic_0001>

<bundles_post_ra>
// kernel: tpu_custom_call.1
= control target key start
LH: loop header
LB: loop body
LE: loop exit
PB: predicated region body
PF: predicated region fallthrough
CT: control target
= control target key end

     0   :  { %6 = vsyncpa [#allocation3], 0  ;;  %s1257_s6 = smov [#allocation2]   ;;  %s1519_s0 = inlined_call_operand.hbm [shape: f32[34,76], index: 0, kind: input, shape index: {}]   ;;  %s1520_s1 = inlined_call_operand.vmem [shape: f32[34,6], index: 1, kind: output, shape index: {}]  }
   0x1   :  { %s12_s7 = sshll.u32 %s1257_s6, 4  ;;  %s1233_s10 = scalar_lea.hbm %s1519_s0, 640  ;;  %s13_s7 = int_to_ptr.vmem [resolvable:$true] %s12_s7 }
   0x2   :  { %p1234_p0 = scmp.ne.s32.totalorder %s1519_s0, %s1233_s10  ;;  %p1237_p1 = scmp.lt.u32.totalorder %s1233_s10, %s1519_s0 }
   0x4   :  { %p1239_p2 = pnand %p1237_p1, %p1234_p0 }
   0x6   :  { %1242 = shalt.err (!%p1239_p2)
}
   0x7   :  { %s1243_s15 = scalar_lea.vmem %s13_s7, 640  ;;  %p1248_p4 = scmp.lt.s32.totalorder %s13_s7, %s13_s7 }
   0x8   :  { %p1244_p3 = scmp.ne.s32.totalorder %s13_s7, %s1243_s15  ;;  %p1249_p5 = scmp.lt.s32.totalorder %s1243_s15, %s1243_s15 }
   0xa   :  { %p1250_p6 = por %p1249_p5, %p1248_p4 }
   0xc   :  { %p1251_p7 = pnand %p1250_p6, %p1244_p3 }
   0xe   :  { %1254 = shalt.err (!%p1251_p7)
}
   0xf   :  { %s1258_s16 = smov 128   ;;  %s1259_s17 = smov 8  }
  0x10   :  { %18 = dma.hbm_to_vmem [thread:$0]  %s1519_s0, 640, %s13_s7, [#allocation3], %s1258_s16, %s1258_s16, %s1259_s17  }
  0x11   :  { %1255 = dma.done.wait [#allocation3], 640  }
  0x12   :  { %1256 = vsyncadd [#allocation3], 4294966656  ;;  %v1260_v0 = vmov 0.0|0.0   ;;  %v1295_v1 = vld [vmem:[#allocation2] sm:$0xff]  ;;  %v1297_v2 = vld [vmem:[#allocation2 + $0x8] sm:$0xff]  ;;  %vm1261_vm0 = vmmov 0   ;;  %v308_v61 = vlaneseq }
  0x13   :  { %1087 = vmatprep.subr.bf16.mxu0 %v1260_v0  ;;  %1093 = vmatprep.subr.bf16.mxu1 %v1260_v0  ;;  %v1299_v3 = vld [vmem:[#allocation2 + $0x10] sm:$0xff]  ;;  %v1262_v4 = vmov 0.0   ;;  %v1125_v5 = vpack.i.bf16 %v1297_v2, %v1295_v1  ;;  %v1307_v6 = vld [vmem:[#allocation2 + $0x18] sm:$0xff]  ;;  %v1309_v7 = vld [vmem:[#allocation2 + $0x20] sm:$0x3]  ;;  %s1263_s0 = smov 60  }
  0x14   :  { %997 = vmatprep.mubr.msk.f32.mxu0 %vm1261_vm0, %v1262_v4  ;;  %1022 = vmatprep.mubr.msk.f32.mxu1 %vm1261_vm0, %v1262_v4  ;;  %v1130_v8 = vpack.i.bf16 %v1307_v6, %v1299_v3  ;;  %s1264_s20 = smov 94   ;;  %vm74_vm1 = vcmask 1041408   ;;  %vm63_vm2 = vcmask 277504   ;;  %v925_v23 = vld [vmem:[#allocation2] ss:$0 sm:$0xff]  ;;  %s1265_s21 = smov 56  }
  0x15   :  { %57 = vrot.lane.b32.xlu1 %v1309_v7, %s1263_s0  ;;  %1126 = vrot.lane.b32.xlu0 %v1125_v5, %s1263_s0  ;;  %v1266_v36 = vmov 2   ;;  %v1267_v37 = vmov 0   ;;  %v1268_v53 = vmov 3   ;;  %v1269_v54 = vmov 1   ;;  %s1270_s3 = smov 58  }
  0x16   :  { %1137 = vset.pattern.permute.xlu0 %v1266_v36  ;;  %1135 = vset.pattern.permute.xlu1 %v1267_v37  ;;  %v1383_v62 = vshrl.u32 %v308_v61, 7  ;;  %vm880_vm3 = vcmask 15360   ;;  %vm885_vm4 = vcmask 9216   ;;  %vm907_vm5 = vcmask 48144  }
  0x17   :  { %vm912_vm6 = vcmask 42000  }
  0x19   :  { %39 = vrot.lane.b32.xlu1 %v1295_v1, %s1264_s20  ;;  %1131 = vrot.lane.b32.xlu0 %v1130_v8, %s1263_s0  ;;  %v1386_v8 = vsub.s32 1, %v1383_v62 }
  0x1d   :  { %43 = vrot.lane.b32.xlu1 %v1299_v3, %s1264_s20  ;;  %41 = vrot.lane.b32.xlu0 %v1297_v2, %s1264_s20 }
  0x21   :  { %47 = vrot.lane.b32.xlu1 %v1309_v7, %s1264_s20  ;;  %45 = vrot.lane.b32.xlu0 %v1307_v6, %s1264_s20 }
  0x25   :  { %172 = vrot.lane.b32.xlu0 %v925_v23, %s1265_s21 }
  0x87   :  { %v1127_v9 = vpop.permute.xlu0 %1126  ;;  %v58_v16 = vpop.permute.xlu1 %57 }
  0x88   :  { %v1129_v10 = vunpack.i.h.bf16 %v1127_v9  ;;  %v1128_v11 = vunpack.i.l.bf16 %v1127_v9  ;;  %v1389_v9 = vsub.s32 0, %v1383_v62 }
  0x8a   :  { %v1088_v12 = vpack.c.bf16 %v1129_v10, %v1128_v11  ;;  %v28_v10 = vld [vmem:[#allocation2 + $0x1] sm:$0xf] }
  0x8b   :  { %v1132_v13 = vpop.permute.xlu0 %1131  ;;  %v40_v18 = vpop.permute.xlu1 %39 }
  0x8c   :  { %v1134_v14 = vunpack.i.h.bf16 %v1132_v13  ;;  %v1133_v15 = vunpack.i.l.bf16 %v1132_v13  ;;  %1089 = vmatpush3.bf16.msra.mxu0 %v1088_v12  ;;  %v340_v13 = vrot.slane %v28_v10, %v1386_v8 }
  0x8d   :  { %1090 = vmatprep.subr.bf16.mxu0 %v1260_v0 }
  0x8e   :  { %v1091_v17 = vpack.c.bf16 %v1134_v14, %v1133_v15  ;;  %v373_v14 = vsub.s32 2, %v1383_v62  ;;  %v311_v15 = vrot.slane %v28_v10, %v1389_v9 }
  0x8f   :  { %v42_v19 = vpop.permute.xlu0 %41  ;;  %v44_v20 = vpop.permute.xlu1 %43 }
  0x90   :  { %1092 = vmatpush3.bf16.msra.mxu0 %v1091_v17 }
  0x91   :  { %995 = vmatprep.subr.mxu0 %v1262_v4 }
  0x93   :  { %v46_v21 = vpop.permute.xlu0 %45  ;;  %v48_v22 = vpop.permute.xlu1 %47 }
  0x94   :  { %996 = vmatpush3.msk.msra.mxu0 %vm74_vm1, %v58_v16 }
  0x95   :  { %998 = vmatmul.mubr.msk.f32.vlgmr.msra.gmra.mrb[0].mxu0 %vm63_vm2, %v40_v18  ;;  %1099 = vmatprep.subr.bf16.mxu0 %v1260_v0 }
  0x96   :  { %1000 = vmatprep.mubr.msk.f32.mxu0 %vm1261_vm0, %v1262_v4 }
  0x97   :  { %v173_v38 = vpop.permute.xlu0 %172 }
  0x99   :  { %1001 = vmatmul.mubr.msk.f32.gmra.mrb[2].mxu0 %vm63_vm2, %v42_v19  ;;  %v374_v19 = vrot.slane %v28_v10, %v373_v14 }
  0x9a   :  { %1003 = vmatprep.mubr.msk.f32.mxu0 %vm1261_vm0, %v1262_v4 }
  0x9d   :  { %1004 = vmatmul.mubr.msk.f32.gmra.mrb[4].mxu0 %vm63_vm2, %v44_v20 }
  0x9e   :  { %1006 = vmatprep.mubr.msk.f32.mxu0 %vm1261_vm0, %v1262_v4 }
  0xa1   :  { %1007 = vmatmul.mubr.msk.f32.gmra.mrb[6].mxu0 %vm63_vm2, %v46_v21  ;;  %v407_v21 = vsub.s32 3, %v1383_v62 }
  0xa2   :  { %1009 = vmatprep.mubr.msk.f32.mxu0 %vm1261_vm0, %v1262_v4 }
  0xa5   :  { %1010 = vmatmul.mubr.msk.f32.gmra.mrb[8].mxu0 %vm63_vm2, %v48_v22 }
  0xa6   :  { %1047 = vmatprep.mubr.msk.f32.mxu0 %vm1261_vm0, %v1262_v4 }
 0x168   :  { %v143_v24 = vpop.f32.mrb[0].mxu0 }
 0x169   :  { %v999_v25 = vpop.f32.mrb[1].mxu0 }
 0x16c   :  { %v148_v26 = vpop.f32.mrb[2].mxu0 }
 0x16d   :  { %v1094_v27 = vpack.c.bf16 %v148_v26, %v143_v24  ;;  %v1002_v28 = vpop.f32.mrb[3].mxu0 }
 0x16f   :  { %1095 = vmatpush3.bf16.msra.mxu1 %v1094_v27  ;;  %v408_v27 = vrot.slane %v28_v10, %v407_v21 }
 0x170   :  { %v153_v29 = vpop.f32.mrb[4].mxu0  ;;  %1096 = vmatprep.subr.bf16.mxu1 %v1260_v0 }
 0x171   :  { %v1005_v30 = vpop.f32.mrb[5].mxu0 }
 0x174   :  { %v158_v31 = vpop.f32.mrb[6].mxu0 }
 0x175   :  { %v1097_v32 = vpack.c.bf16 %v158_v31, %v153_v29  ;;  %v1008_v33 = vpop.f32.mrb[7].mxu0 }
 0x177   :  { %1098 = vmatpush3.bf16.msra.mxu1 %v1097_v32 }
 0x178   :  { %v163_v34 = vpop.f32.mrb[8].mxu0  ;;  %1020 = vmatprep.subr.mxu1 %v1262_v4 }
 0x179   :  { %v1011_v35 = vpop.f32.mrb[9].mxu0 }
 0x17b   :  { %1021 = vmatpush3.msk.msra.mxu1 %vm74_vm1, %v163_v34 }
 0x17c   :  { %1023 = vmatmul.mubr.msk.f32.vlgmr.msra.gmra.mrb[0].mxu1 %vm63_vm2, %v1295_v1  ;;  %1105 = vmatprep.subr.bf16.mxu1 %v1260_v0 }
 0x17d   :  { %1025 = vmatprep.mubr.msk.f32.mxu1 %vm1261_vm0, %v1262_v4 }
 0x180   :  { %1026 = vmatmul.mubr.msk.f32.gmra.mrb[2].mxu1 %vm63_vm2, %v1297_v2 }
 0x181   :  { %1028 = vmatprep.mubr.msk.f32.mxu1 %vm1261_vm0, %v1262_v4 }
 0x184   :  { %1029 = vmatmul.mubr.msk.f32.gmra.mrb[4].mxu1 %vm63_vm2, %v1299_v3 }
 0x185   :  { %1031 = vmatprep.mubr.msk.f32.mxu1 %vm1261_vm0, %v1262_v4 }
 0x188   :  { %1032 = vmatmul.mubr.msk.f32.gmra.mrb[6].mxu1 %vm63_vm2, %v1307_v6 }
 0x189   :  { %1034 = vmatprep.mubr.msk.f32.mxu1 %vm1261_vm0, %v1262_v4 }
 0x18c   :  { %1035 = vmatmul.mubr.msk.f32.gmra.mrb[8].mxu1 %vm63_vm2, %v1309_v7 }
 0x18d   :  { %1072 = vmatprep.mubr.msk.f32.mxu1 %vm1261_vm0, %v1262_v4 }
 0x24f   :  { %v254_v39 = vpop.f32.mrb[0].mxu1 }
 0x250   :  { %v255_v40 = vadd.f32 %v254_v39, %v173_v38  ;;  %v1024_v41 = vpop.f32.mrb[1].mxu1 }
 0x252   :  { %1203 = vtanh.f32 %v255_v40 }
 0x253   :  { %v259_v42 = vpop.f32.mrb[2].mxu1 }
 0x254   :  { %v1027_v43 = vpop.f32.mrb[3].mxu1  ;;  %v260_v44 = vadd.f32 %v259_v42, %v173_v38 }
 0x256   :  { %1205 = vtanh.f32 %v260_v44 }
 0x257   :  { %v264_v45 = vpop.f32.mrb[4].mxu1 }
 0x258   :  { %v1030_v46 = vpop.f32.mrb[5].mxu1  ;;  %v265_v56 = vadd.f32 %v264_v45, %v173_v38 }
 0x25b   :  { %v269_v47 = vpop.f32.mrb[6].mxu1 }
 0x25c   :  { %v1204_v48 = vpop.eup %1203  ;;  %v270_v49 = vadd.f32 %v269_v47, %v173_v38  ;;  %v1033_v50 = vpop.f32.mrb[7].mxu1 }
 0x25d   :  { %352 = vperm.xlu0 %1137, %v1204_v48   ;;  %285 = vperm.xlu1 %1135, %v1204_v48  }
 0x25e   :  { %1207 = vtanh.f32 %v270_v49 }
 0x25f   :  { %v274_v51 = vpop.f32.mrb[8].mxu1  ;;  %1209 = vtanh.f32 %v265_v56 }
 0x260   :  { %v1036_v52 = vpop.f32.mrb[9].mxu1  ;;  %v1206_v55 = vpop.eup %1205  ;;  %v275_v57 = vadd.f32 %v274_v51, %v173_v38 }
 0x261   :  { %1138 = vset.pattern.permute.xlu0 %v1268_v53  ;;  %1136 = vset.pattern.permute.xlu1 %v1269_v54 }
 0x262   :  { %386 = vperm.xlu0 %1138, %v1204_v48   ;;  %318 = vperm.xlu1 %1136, %v1204_v48   ;;  %1211 = vtanh.f32 %v275_v57 }
 0x266   :  { %1139 = vset.pattern.permute.xlu0 %v1267_v37  ;;  %322 = vperm.xlu1 %1136, %v1206_v55  }
 0x267   :  { %290 = vperm.xlu0 %1139, %v1206_v55  }
 0x268   :  { %v1208_v58 = vpop.eup %1207 }
 0x269   :  { %v1210_v59 = vpop.eup %1209 }
 0x26a   :  { %1140 = vset.pattern.permute.xlu1 %v1266_v36 }
 0x26b   :  { %356 = vperm.xlu1 %1140, %v1206_v55   ;;  %300 = vperm.xlu0 %1139, %v1208_v58  }
 0x26c   :  { %v1212_v60 = vpop.eup %1211 }
 0x26f   :  { %1141 = vset.pattern.permute.xlu1 %v1268_v53  ;;  %1147 = vset.pattern.permute.xlu0 %v1266_v36 }
 0x270   :  { %390 = vperm.xlu1 %1141, %v1206_v55   ;;  %364 = vperm.xlu0 %1147, %v1208_v58  }
 0x274   :  { %1142 = vset.pattern.permute.xlu1 %v1267_v37  ;;  %1149 = vset.pattern.permute.xlu0 %v1267_v37 }
 0x275   :  { %295 = vperm.xlu1 %1142, %v1210_v59   ;;  %305 = vperm.xlu0 %1149, %v1212_v60  }
 0x279   :  { %1143 = vset.pattern.permute.xlu1 %v1269_v54  ;;  %1152 = vset.pattern.permute.xlu0 %v1268_v53 }
 0x27a   :  { %326 = vperm.xlu1 %1143, %v1210_v59   ;;  %402 = vperm.xlu0 %1152, %v1212_v60  }
 0x27e   :  { %1144 = vset.pattern.permute.xlu1 %v1266_v36  ;;  %1163 = vset.pattern.permute.xlu0 %v1267_v37 }
 0x27f   :  { %360 = vperm.xlu1 %1144, %v1210_v59  }
 0x283   :  { %1145 = vset.pattern.permute.xlu1 %v1268_v53 }
 0x284   :  { %394 = vperm.xlu1 %1145, %v1210_v59  }
 0x288   :  { %1146 = vset.pattern.permute.xlu1 %v1269_v54 }
 0x289   :  { %330 = vperm.xlu1 %1146, %v1208_v58  }
 0x28d   :  { %1148 = vset.pattern.permute.xlu1 %v1268_v53 }
 0x28e   :  { %398 = vperm.xlu1 %1148, %v1208_v58  }
 0x292   :  { %1150 = vset.pattern.permute.xlu1 %v1269_v54 }
 0x293   :  { %334 = vperm.xlu1 %1150, %v1212_v60  }
 0x297   :  { %1151 = vset.pattern.permute.xlu1 %v1266_v36 }
 0x298   :  { %368 = vperm.xlu1 %1151, %v1212_v60  }
 0x29c   :  { %1164 = vset.pattern.permute.xlu1 %v1269_v54 }
 0x2dc   :  { %v353_v63 = vpop.permute.xlu0 %352  ;;  %v286_v5 = vpop.permute.xlu1 %285 }
 0x2dd   :  { %v312_v20 = vmul.f32 %v311_v15, %v286_v5  ;;  %v375_v26 = vmul.f32 %v374_v19, %v353_v63 }
 0x2e1   :  { %v387_v11 = vpop.permute.xlu0 %386  ;;  %v319_v12 = vpop.permute.xlu1 %318 }
 0x2e2   :  { %v341_v17 = vmul.f32 %v340_v13, %v319_v12  ;;  %v409_v32 = vmul.f32 %v408_v27, %v387_v11 }
 0x2e4   :  { %v346_v22 = vadd.f32 %v341_v17, %v312_v20 }
 0x2e5   :  { %v323_v16 = vpop.permute.xlu1 %322 }
 0x2e6   :  { %v291_v18 = vpop.permute.xlu0 %290  ;;  %v342_v23 = vmul.f32 %v340_v13, %v323_v16  ;;  %v380_v29 = vadd.f32 %v375_v26, %v346_v22 }
 0x2e7   :  { %v313_v24 = vmul.f32 %v311_v15, %v291_v18 }
 0x2e8   :  { %v414_v38 = vadd.f32 %v409_v32, %v380_v29 }
 0x2e9   :  { %v347_v30 = vadd.f32 %v342_v23, %v313_v24 }
 0x2ea   :  { %v357_v25 = vpop.permute.xlu1 %356  ;;  %v301_v43 = vpop.permute.xlu0 %300 }
 0x2eb   :  { %v376_v28 = vmul.f32 %v374_v19, %v357_v25  ;;  %v315_v48 = vmul.f32 %v311_v15, %v301_v43 }
 0x2ed   :  { %v381_v33 = vadd.f32 %v376_v28, %v347_v30  ;;  %v932_v28 = vld [vmem:[#allocation2 + $0x5] ss:$0 sm:$0xff] }
 0x2ef   :  { %v391_v31 = vpop.permute.xlu1 %390  ;;  %v365_v45 = vpop.permute.xlu0 %364 }
 0x2f0   :  { %v410_v34 = vmul.f32 %v408_v27, %v391_v31  ;;  %v378_v52 = vmul.f32 %v374_v19, %v365_v45 }
 0x2f2   :  { %v415_v35 = vadd.f32 %v410_v34, %v381_v33 }
 0x2f4   :  { %v296_v39 = vpop.permute.xlu1 %295  ;;  %v1153_v40 = vpack.i.bf16 %v415_v35, %v414_v38  ;;  %v306_v10 = vpop.permute.xlu0 %305 }
 0x2f5   :  { %v314_v50 = vmul.f32 %v311_v15, %v296_v39  ;;  %v316_v17 = vmul.f32 %v311_v15, %v306_v10 }
 0x2f6   :  { %1154 = vrot.lane.b32.xlu1 %v1153_v40, %s1265_s21 }
 0x2f9   :  { %v327_v41 = vpop.permute.xlu1 %326  ;;  %v403_v18 = vpop.permute.xlu0 %402 }
 0x2fa   :  { %v343_v46 = vmul.f32 %v340_v13, %v327_v41  ;;  %v413_v24 = vmul.f32 %v408_v27, %v403_v18 }
 0x2fc   :  { %v348_v56 = vadd.f32 %v343_v46, %v314_v50 }
 0x2fe   :  { %v361_v42 = vpop.permute.xlu1 %360 }
 0x2ff   :  { %v377_v51 = vmul.f32 %v374_v19, %v361_v42 }
 0x301   :  { %v382_v60 = vadd.f32 %v377_v51, %v348_v56 }
 0x303   :  { %v395_v44 = vpop.permute.xlu1 %394 }
 0x304   :  { %v411_v57 = vmul.f32 %v408_v27, %v395_v44 }
 0x306   :  { %v416_v63 = vadd.f32 %v411_v57, %v382_v60 }
 0x308   :  { %v331_v47 = vpop.permute.xlu1 %330 }
 0x309   :  { %v344_v49 = vmul.f32 %v340_v13, %v331_v47 }
 0x30b   :  { %v349_v55 = vadd.f32 %v344_v49, %v315_v48 }
 0x30d   :  { %v399_v58 = vpop.permute.xlu1 %398  ;;  %v383_v59 = vadd.f32 %v378_v52, %v349_v55 }
 0x30e   :  { %v412_v61 = vmul.f32 %v408_v27, %v399_v58 }
 0x310   :  { %v417_v5 = vadd.f32 %v412_v61, %v383_v59 }
 0x312   :  { %v335_v11 = vpop.permute.xlu1 %334  ;;  %v1158_v12 = vpack.i.bf16 %v417_v5, %v416_v63  ;;  %v30_v63 = vld [vmem:[#allocation2 + $0x6] sm:$0xf] }
 0x313   :  { %v345_v16 = vmul.f32 %v340_v13, %v335_v11  ;;  %v571_v11 = vrot.slane %v30_v63, %v1389_v9 }
 0x314   :  { %1159 = vrot.lane.b32.xlu1 %v1158_v12, %s1265_s21  ;;  %v634_v12 = vrot.slane %v30_v63, %v373_v14 }
 0x315   :  { %v350_v22 = vadd.f32 %v345_v16, %v316_v17 }
 0x317   :  { %v369_v20 = vpop.permute.xlu1 %368 }
 0x318   :  { %v379_v23 = vmul.f32 %v374_v19, %v369_v20  ;;  %443 = vrot.lane.b32.xlu1 %v932_v28, %s1265_s21 }
 0x31a   :  { %v384_v25 = vadd.f32 %v379_v23, %v350_v22 }
 0x31c   :  { %v418_v26 = vadd.f32 %v413_v24, %v384_v25 }
 0x31e   :  { %436 = vrot.lane.b32.xlu0 %v418_v26, %s1265_s21 }
 0x368   :  { %v1155_v29 = vpop.permute.xlu1 %1154 }
 0x369   :  { %v1157_v30 = vunpack.i.h.bf16 %v1155_v29  ;;  %v1156_v31 = vunpack.i.l.bf16 %v1155_v29 }
 0x36b   :  { %v1100_v32 = vpack.c.bf16 %v1157_v30, %v1156_v31 }
 0x36d   :  { %1101 = vmatpush3.bf16.msra.mxu0 %v1100_v32 }
 0x36e   :  { %1102 = vmatprep.subr.bf16.mxu0 %v1260_v0 }
 0x386   :  { %v1160_v13 = vpop.permute.xlu1 %1159 }
 0x387   :  { %v1162_v15 = vunpack.i.h.bf16 %v1160_v13  ;;  %v1161_v33 = vunpack.i.l.bf16 %v1160_v13 }
 0x389   :  { %v1103_v34 = vpack.c.bf16 %v1162_v15, %v1161_v33 }
 0x38a   :  { %v444_v27 = vpop.permute.xlu1 %443 }
 0x38b   :  { %1104 = vmatpush3.bf16.msra.mxu0 %v1103_v34 }
 0x38c   :  { %1045 = vmatprep.subr.mxu0 %v1262_v4 }
 0x390   :  { %v437_v19 = vpop.permute.xlu0 %436 }
 0x391   :  { %1046 = vmatpush3.msk.msra.mxu0 %vm74_vm1, %v437_v19 }
 0x392   :  { %1048 = vmatmul.mubr.msk.f32.vlgmr.msra.gmra.mrb[10].mxu0 %vm63_vm2, %v1295_v1 }
 0x393   :  { %1050 = vmatprep.mubr.msk.f32.mxu0 %vm1261_vm0, %v1262_v4 }
 0x396   :  { %1051 = vmatmul.mubr.msk.f32.gmra.mrb[12].mxu0 %vm63_vm2, %v1297_v2 }
 0x397   :  { %1053 = vmatprep.mubr.msk.f32.mxu0 %vm1261_vm0, %v1262_v4 }
 0x39a   :  { %1054 = vmatmul.mubr.msk.f32.gmra.mrb[14].mxu0 %vm63_vm2, %v1299_v3 }
 0x39b   :  { %1056 = vmatprep.mubr.msk.f32.mxu0 %vm1261_vm0, %v1262_v4 }
 0x39e   :  { %1057 = vmatmul.mubr.msk.f32.gmra.mrb[16].mxu0 %vm63_vm2, %v1307_v6 }
 0x39f   :  { %1059 = vmatprep.mubr.msk.f32.mxu0 %vm1261_vm0, %v1262_v4 }
 0x3a2   :  { %1060 = vmatmul.mubr.msk.f32.gmra.mrb[18].mxu0 %vm63_vm2, %v1309_v7 }
 0x465   :  { %v514_v35 = vpop.f32.mrb[10].mxu0 }
 0x466   :  { %v515_v38 = vadd.f32 %v514_v35, %v444_v27  ;;  %v1049_v39 = vpop.f32.mrb[11].mxu0 }
 0x468   :  { %1213 = vtanh.f32 %v515_v38 }
 0x469   :  { %v519_v40 = vpop.f32.mrb[12].mxu0 }
 0x46a   :  { %v520_v41 = vadd.f32 %v519_v40, %v444_v27  ;;  %v1052_v42 = vpop.f32.mrb[13].mxu0 }
 0x46c   :  { %1215 = vtanh.f32 %v520_v41 }
 0x46d   :  { %v524_v43 = vpop.f32.mrb[14].mxu0 }
 0x46e   :  { %v525_v44 = vadd.f32 %v524_v43, %v444_v27  ;;  %v1055_v45 = vpop.f32.mrb[15].mxu0 }
 0x470   :  { %1217 = vtanh.f32 %v525_v44 }
 0x471   :  { %v529_v46 = vpop.f32.mrb[16].mxu0 }
 0x472   :  { %v1214_v47 = vpop.eup %1213  ;;  %v1058_v48 = vpop.f32.mrb[17].mxu0  ;;  %v530_v52 = vadd.f32 %v529_v46, %v444_v27 }
 0x473   :  { %578 = vperm.xlu1 %1164, %v1214_v47   ;;  %545 = vperm.xlu0 %1163, %v1214_v47  }
 0x474   :  { %1219 = vtanh.f32 %v530_v52 }
 0x475   :  { %v534_v49 = vpop.f32.mrb[18].mxu0 }
 0x476   :  { %v1216_v50 = vpop.eup %1215  ;;  %v1061_v51 = vpop.f32.mrb[19].mxu0  ;;  %v535_v56 = vadd.f32 %v534_v49, %v444_v27 }
 0x477   :  { %1165 = vset.pattern.permute.xlu1 %v1266_v36  ;;  %1168 = vset.pattern.permute.xlu0 %v1269_v54 }
 0x478   :  { %612 = vperm.xlu1 %1165, %v1214_v47   ;;  %582 = vperm.xlu0 %1168, %v1216_v50   ;;  %1221 = vtanh.f32 %v535_v56 }
 0x47a   :  { %v1218_v55 = vpop.eup %1217 }
 0x47c   :  { %1166 = vset.pattern.permute.xlu1 %v1268_v53  ;;  %1171 = vset.pattern.permute.xlu0 %v1267_v37 }
 0x47d   :  { %646 = vperm.xlu1 %1166, %v1214_v47   ;;  %555 = vperm.xlu0 %1171, %v1218_v55  }
 0x47e   :  { %v1220_v57 = vpop.eup %1219 }
 0x481   :  { %1167 = vset.pattern.permute.xlu1 %v1267_v37  ;;  %1173 = vset.pattern.permute.xlu0 %v1266_v36 }
 0x482   :  { %550 = vperm.xlu1 %1167, %v1216_v50   ;;  %620 = vperm.xlu0 %1173, %v1218_v55   ;;  %v1222_v58 = vpop.eup %1221 }
 0x486   :  { %1169 = vset.pattern.permute.xlu1 %v1266_v36  ;;  %1176 = vset.pattern.permute.xlu0 %v1269_v54 }
 0x487   :  { %616 = vperm.xlu1 %1169, %v1216_v50   ;;  %590 = vperm.xlu0 %1176, %v1220_v57  }
 0x48b   :  { %1170 = vset.pattern.permute.xlu1 %v1268_v53  ;;  %1178 = vset.pattern.permute.xlu0 %v1268_v53 }
 0x48c   :  { %650 = vperm.xlu1 %1170, %v1216_v50   ;;  %658 = vperm.xlu0 %1178, %v1220_v57  }
 0x490   :  { %1172 = vset.pattern.permute.xlu1 %v1269_v54  ;;  %1181 = vset.pattern.permute.xlu0 %v1266_v36 }
 0x491   :  { %586 = vperm.xlu1 %1172, %v1218_v55   ;;  %628 = vperm.xlu0 %1181, %v1222_v58  }
 0x495   :  { %1174 = vset.pattern.permute.xlu1 %v1268_v53  ;;  %1195 = vset.pattern.permute.xlu0 %v1267_v37 }
 0x496   :  { %654 = vperm.xlu1 %1174, %v1218_v55  }
 0x49a   :  { %1175 = vset.pattern.permute.xlu1 %v1267_v37 }
 0x49b   :  { %560 = vperm.xlu1 %1175, %v1220_v57  }
 0x49f   :  { %1177 = vset.pattern.permute.xlu1 %v1266_v36  ;;  %v600_v36 = vrot.slane %v30_v63, %v1386_v8 }
 0x4a0   :  { %624 = vperm.xlu1 %1177, %v1220_v57  }
 0x4a4   :  { %1179 = vset.pattern.permute.xlu1 %v1267_v37 }
 0x4a5   :  { %565 = vperm.xlu1 %1179, %v1222_v58  }
 0x4a9   :  { %1180 = vset.pattern.permute.xlu1 %v1269_v54 }
 0x4aa   :  { %594 = vperm.xlu1 %1180, %v1222_v58  }
 0x4ae   :  { %1182 = vset.pattern.permute.xlu1 %v1268_v53  ;;  %v668_v53 = vrot.slane %v30_v63, %v407_v21 }
 0x4af   :  { %662 = vperm.xlu1 %1182, %v1222_v58  }
 0x4b3   :  { %1193 = vset.pattern.permute.xlu1 %v1267_v37 }
 0x4f2   :  { %v579_v59 = vpop.permute.xlu1 %578  ;;  %v546_v5 = vpop.permute.xlu0 %545 }
 0x4f3   :  { %v601_v17 = vmul.f32 %v600_v36, %v579_v59  ;;  %v572_v18 = vmul.f32 %v571_v11, %v546_v5 }
 0x4f5   :  { %v606_v26 = vadd.f32 %v601_v17, %v572_v18 }
 0x4f7   :  { %v613_v60 = vpop.permute.xlu1 %612  ;;  %v583_v16 = vpop.permute.xlu0 %582 }
 0x4f8   :  { %v635_v23 = vmul.f32 %v634_v12, %v613_v60  ;;  %v602_v24 = vmul.f32 %v600_v36, %v583_v16 }
 0x4fa   :  { %v640_v31 = vadd.f32 %v635_v23, %v606_v26 }
 0x4fc   :  { %v647_v61 = vpop.permute.xlu1 %646  ;;  %v556_v15 = vpop.permute.xlu0 %555 }
 0x4fd   :  { %v669_v28 = vmul.f32 %v668_v53, %v647_v61  ;;  %v574_v38 = vmul.f32 %v571_v11, %v556_v15 }
 0x4ff   :  { %v674_v14 = vadd.f32 %v669_v28, %v640_v31 }
 0x501   :  { %v551_v10 = vpop.permute.xlu1 %550  ;;  %v621_v62 = vpop.permute.xlu0 %620 }
 0x502   :  { %v573_v20 = vmul.f32 %v571_v11, %v551_v10  ;;  %v637_v42 = vmul.f32 %v634_v12, %v621_v62 }
 0x504   :  { %v607_v29 = vadd.f32 %v602_v24, %v573_v20  ;;  %v939_v20 = vld [vmem:[#allocation2 + $0xa] ss:$0 sm:$0xff] }
 0x506   :  { %v617_v22 = vpop.permute.xlu1 %616  ;;  %v591_v35 = vpop.permute.xlu0 %590 }
 0x507   :  { %v636_v25 = vmul.f32 %v634_v12, %v617_v22  ;;  %v604_v43 = vmul.f32 %v600_v36, %v591_v35  ;;  %v32_v35 = vld [vmem:[#allocation2 + $0xb] sm:$0x3] }
 0x509   :  { %v641_v32 = vadd.f32 %v636_v25, %v607_v29 }
 0x50b   :  { %v651_v30 = vpop.permute.xlu1 %650  ;;  %v659_v44 = vpop.permute.xlu0 %658 }
 0x50c   :  { %v670_v13 = vmul.f32 %v668_v53, %v651_v30  ;;  %v672_v50 = vmul.f32 %v668_v53, %v659_v44 }
 0x50e   :  { %v675_v33 = vadd.f32 %v670_v13, %v641_v32 }
 0x510   :  { %v587_v34 = vpop.permute.xlu1 %586  ;;  %v1183_v19 = vpack.i.bf16 %v675_v33, %v674_v14  ;;  %v629_v58 = vpop.permute.xlu0 %628 }
 0x511   :  { %v603_v27 = vmul.f32 %v600_v36, %v587_v34  ;;  %v639_v63 = vmul.f32 %v634_v12, %v629_v58 }
 0x512   :  { %1184 = vrot.lane.b32.xlu1 %v1183_v19, %s1265_s21 }
 0x513   :  { %v608_v40 = vadd.f32 %v603_v27, %v574_v38 }
 0x515   :  { %v655_v21 = vpop.permute.xlu1 %654  ;;  %v642_v46 = vadd.f32 %v637_v42, %v608_v40  ;;  %v860_v40 = vrot.slane %v32_v35, %v1386_v8 }
 0x516   :  { %v671_v47 = vmul.f32 %v668_v53, %v655_v21 }
 0x518   :  { %v676_v52 = vadd.f32 %v671_v47, %v642_v46 }
 0x51a   :  { %v561_v39 = vpop.permute.xlu1 %560 }
 0x51b   :  { %v575_v41 = vmul.f32 %v571_v11, %v561_v39  ;;  %v831_v39 = vrot.slane %v32_v35, %v1389_v9 }
 0x51d   :  { %v609_v48 = vadd.f32 %v604_v43, %v575_v41 }
 0x51f   :  { %v625_v45 = vpop.permute.xlu1 %624 }
 0x520   :  { %v638_v49 = vmul.f32 %v634_v12, %v625_v45  ;;  %v946_v45 = vld [vmem:[#allocation2 + $0xd] ss:$0 sm:$0xff] }
 0x522   :  { %v643_v51 = vadd.f32 %v638_v49, %v609_v48 }
 0x524   :  { %v677_v55 = vadd.f32 %v672_v50, %v643_v51  ;;  %v566_v56 = vpop.permute.xlu1 %565 }
 0x525   :  { %v576_v60 = vmul.f32 %v571_v11, %v566_v56 }
 0x526   :  { %v1188_v57 = vpack.i.bf16 %v677_v55, %v676_v52 }
 0x528   :  { %1189 = vrot.lane.b32.xlu0 %v1188_v57, %s1265_s21 }
 0x529   :  { %v595_v59 = vpop.permute.xlu1 %594 }
 0x52a   :  { %v605_v61 = vmul.f32 %v600_v36, %v595_v59 }
 0x52c   :  { %v610_v5 = vadd.f32 %v605_v61, %v576_v60  ;;  %703 = vrot.lane.b32.xlu0 %v939_v20, %s1265_s21 }
 0x52e   :  { %v644_v10 = vadd.f32 %v639_v63, %v610_v5  ;;  %v663_v16 = vpop.permute.xlu1 %662 }
 0x52f   :  { %v673_v17 = vmul.f32 %v668_v53, %v663_v16 }
 0x531   :  { %v678_v18 = vadd.f32 %v673_v17, %v644_v10 }
 0x533   :  { %696 = vrot.lane.b32.xlu1 %v678_v18, %s1265_s21 }
 0x584   :  { %v1185_v22 = vpop.permute.xlu1 %1184 }
 0x585   :  { %v1187_v23 = vunpack.i.h.bf16 %v1185_v22  ;;  %v1186_v24 = vunpack.i.l.bf16 %v1185_v22 }
 0x587   :  { %v1106_v25 = vpack.c.bf16 %v1187_v23, %v1186_v24 }
 0x589   :  { %1107 = vmatpush3.bf16.msra.mxu1 %v1106_v25 }
 0x58a   :  { %1108 = vmatprep.subr.bf16.mxu1 %v1260_v0 }
 0x59a   :  { %v1190_v11 = vpop.permute.xlu0 %1189 }
 0x59b   :  { %v1192_v36 = vunpack.i.h.bf16 %v1190_v11  ;;  %v1191_v12 = vunpack.i.l.bf16 %v1190_v11 }
 0x59d   :  { %v1109_v26 = vpack.c.bf16 %v1192_v36, %v1191_v12 }
 0x59e   :  { %v704_v0 = vpop.permute.xlu0 %703 }
 0x59f   :  { %1110 = vmatpush3.bf16.msra.mxu1 %v1109_v26 }
 0x5a0   :  { %1070 = vmatprep.subr.mxu1 %v1262_v4 }
 0x5a5   :  { %v697_v53 = vpop.permute.xlu1 %696 }
 0x5a6   :  { %1071 = vmatpush3.msk.msra.mxu1 %vm74_vm1, %v697_v53 }
 0x5a7   :  { %1073 = vmatmul.mubr.msk.f32.vlgmr.msra.gmra.mrb[10].mxu1 %vm63_vm2, %v1295_v1 }
 0x5a8   :  { %1075 = vmatprep.mubr.msk.f32.mxu1 %vm1261_vm0, %v1262_v4 }
 0x5ab   :  { %1076 = vmatmul.mubr.msk.f32.gmra.mrb[12].mxu1 %vm63_vm2, %v1297_v2 }
 0x5ac   :  { %1078 = vmatprep.mubr.msk.f32.mxu1 %vm1261_vm0, %v1262_v4 }
 0x5af   :  { %1079 = vmatmul.mubr.msk.f32.gmra.mrb[14].mxu1 %vm63_vm2, %v1299_v3 }
 0x5b0   :  { %1081 = vmatprep.mubr.msk.f32.mxu1 %vm1261_vm0, %v1262_v4 }
 0x5b3   :  { %1082 = vmatmul.mubr.msk.f32.gmra.mrb[16].mxu1 %vm63_vm2, %v1307_v6 }
 0x5b4   :  { %1084 = vmatprep.mubr.msk.f32.mxu1 %vm1261_vm0, %v1262_v4 }
 0x5b7   :  { %1085 = vmatmul.mubr.msk.f32.gmra.mrb[18].mxu1 %vm63_vm2, %v1309_v7 }
 0x67a   :  { %v774_v1 = vpop.f32.mrb[10].mxu1 }
 0x67b   :  { %v775_v2 = vadd.f32 %v774_v1, %v704_v0  ;;  %v1074_v28 = vpop.f32.mrb[11].mxu1 }
 0x67d   :  { %1223 = vtanh.f32 %v775_v2 }
 0x67e   :  { %v779_v29 = vpop.f32.mrb[12].mxu1 }
 0x67f   :  { %v780_v30 = vadd.f32 %v779_v29, %v704_v0  ;;  %v1077_v3 = vpop.f32.mrb[13].mxu1 }
 0x681   :  { %1225 = vtanh.f32 %v780_v30 }
 0x682   :  { %v784_v31 = vpop.f32.mrb[14].mxu1 }
 0x683   :  { %v785_v32 = vadd.f32 %v784_v31, %v704_v0  ;;  %v1080_v13 = vpop.f32.mrb[15].mxu1 }
 0x685   :  { %1227 = vtanh.f32 %v785_v32 }
 0x686   :  { %v789_v6 = vpop.f32.mrb[16].mxu1 }
 0x687   :  { %v1224_v15 = vpop.eup %1223  ;;  %v790_v4 = vadd.f32 %v789_v6, %v704_v0  ;;  %v1083_v14 = vpop.f32.mrb[17].mxu1 }
 0x688   :  { %805 = vperm.xlu1 %1193, %v1224_v15   ;;  %881 = vst.msk [vmem:[%s1520_s1] sm:$0xff] %vm880_vm3, %v1224_v15 }
 0x689   :  { %1229 = vtanh.f32 %v790_v4 }
 0x68a   :  { %v794_v7 = vpop.f32.mrb[18].mxu1 }
 0x68b   :  { %v1226_v33 = vpop.eup %1225  ;;  %v795_v34 = vadd.f32 %v794_v7, %v704_v0  ;;  %v1086_v19 = vpop.f32.mrb[19].mxu1 }
 0x68c   :  { %1194 = vset.pattern.permute.xlu1 %v1269_v54  ;;  %810 = vperm.xlu0 %1195, %v1226_v33   ;;  %882 = vst.msk [vmem:[%s1520_s1 + $0x8] sm:$0xff] %vm880_vm3, %v1226_v33 }
 0x68d   :  { %1231 = vtanh.f32 %v795_v34  ;;  %838 = vperm.xlu1 %1194, %v1224_v15  }
 0x68f   :  { %v1228_v62 = vpop.eup %1227 }
 0x690   :  { %1196 = vset.pattern.permute.xlu0 %v1269_v54  ;;  %883 = vst.msk [vmem:[%s1520_s1 + $0x10] sm:$0xff] %vm880_vm3, %v1228_v62 }
 0x691   :  { %1197 = vset.pattern.permute.xlu1 %v1267_v37  ;;  %842 = vperm.xlu0 %1196, %v1226_v33  }
 0x692   :  { %815 = vperm.xlu1 %1197, %v1228_v62  }
 0x693   :  { %v1230_v21 = vpop.eup %1229 }
 0x694   :  { %884 = vst.msk [vmem:[%s1520_s1 + $0x18] sm:$0xff] %vm880_vm3, %v1230_v21 }
 0x695   :  { %1201 = vset.pattern.permute.xlu0 %v1267_v37 }
 0x696   :  { %1198 = vset.pattern.permute.xlu1 %v1269_v54 }
 0x697   :  { %v1232_v27 = vpop.eup %1231  ;;  %846 = vperm.xlu1 %1198, %v1228_v62  }
 0x698   :  { %825 = vperm.xlu0 %1201, %v1232_v27   ;;  %886 = vst.msk [vmem:[%s1520_s1 + $0x20] sm:$0x3] %vm885_vm4, %v1232_v27 }
 0x69b   :  { %1199 = vset.pattern.permute.xlu1 %v1267_v37 }
 0x69c   :  { %820 = vperm.xlu1 %1199, %v1230_v21   ;;  %1202 = vset.pattern.permute.xlu0 %v1269_v54 }
 0x69d   :  { %854 = vperm.xlu0 %1202, %v1232_v27  }
 0x6a0   :  { %1200 = vset.pattern.permute.xlu1 %v1269_v54 }
 0x6a1   :  { %850 = vperm.xlu1 %1200, %v1230_v21  }
 0x707   :  { %v806_v38 = vpop.permute.xlu1 %805 }
 0x708   :  { %v832_v43 = vmul.f32 %v831_v39, %v806_v38 }
 0x70b   :  { %v811_v41 = vpop.permute.xlu0 %810 }
 0x70c   :  { %v839_v42 = vpop.permute.xlu1 %838  ;;  %v833_v47 = vmul.f32 %v831_v39, %v811_v41 }
 0x70d   :  { %v861_v44 = vmul.f32 %v860_v40, %v839_v42 }
 0x70f   :  { %v866_v46 = vadd.f32 %v861_v44, %v832_v43 }
 0x710   :  { %v843_v37 = vpop.permute.xlu0 %842 }
 0x711   :  { %v862_v48 = vmul.f32 %v860_v40, %v843_v37  ;;  %v816_v49 = vpop.permute.xlu1 %815  ;;  %v875_v50 = vadd.f32 %v946_v45, %v866_v46 }
 0x712   :  { %v834_v55 = vmul.f32 %v831_v39, %v816_v49 }
 0x713   :  { %v867_v51 = vadd.f32 %v862_v48, %v833_v47  ;;  %892 = vrot.lane.b32.xlu1 %v875_v50, %s1270_s3 }
 0x715   :  { %v876_v54 = vadd.f32 %v946_v45, %v867_v51 }
 0x716   :  { %v847_v52 = vpop.permute.xlu1 %846 }
 0x717   :  { %v863_v9 = vmul.f32 %v860_v40, %v847_v52  ;;  %894 = vrot.lane.b32.xlu0 %v876_v54, %s1270_s3  ;;  %v826_v8 = vpop.permute.xlu0 %825 }
 0x718   :  { %v836_v60 = vmul.f32 %v831_v39, %v826_v8 }
 0x719   :  { %v868_v56 = vadd.f32 %v863_v9, %v834_v55 }
 0x71b   :  { %v821_v57 = vpop.permute.xlu1 %820  ;;  %v877_v58 = vadd.f32 %v946_v45, %v868_v56 }
 0x71c   :  { %v855_v59 = vpop.permute.xlu0 %854  ;;  %v835_v10 = vmul.f32 %v831_v39, %v821_v57 }
 0x71d   :  { %v865_v61 = vmul.f32 %v860_v40, %v855_v59  ;;  %896 = vrot.lane.b32.xlu1 %v877_v58, %s1270_s3 }
 0x71f   :  { %v870_v63 = vadd.f32 %v865_v61, %v836_v60 }
 0x720   :  { %v851_v5 = vpop.permute.xlu1 %850 }
 0x721   :  { %v864_v16 = vmul.f32 %v860_v40, %v851_v5  ;;  %v879_v17 = vadd.f32 %v946_v45, %v870_v63 }
 0x723   :  { %v869_v18 = vadd.f32 %v864_v16, %v835_v10  ;;  %900 = vrot.lane.b32.xlu1 %v879_v17, %s1270_s3 }
 0x725   :  { %v878_v20 = vadd.f32 %v946_v45, %v869_v18 }
 0x727   :  { %898 = vrot.lane.b32.xlu0 %v878_v20, %s1270_s3 }
 0x785   :  { %v893_v22 = vpop.permute.xlu1 %892 }
 0x786   :  { %908 = vst.msk [vmem:[%s1520_s1] sm:$0xff] %vm907_vm5, %v893_v22 }
 0x789   :  { %v895_v23 = vpop.permute.xlu0 %894 }
 0x78a   :  { %909 = vst.msk [vmem:[%s1520_s1 + $0x8] sm:$0xff] %vm907_vm5, %v895_v23 }
 0x78f   :  { %v897_v24 = vpop.permute.xlu1 %896 }
 0x790   :  { %910 = vst.msk [vmem:[%s1520_s1 + $0x10] sm:$0xff] %vm907_vm5, %v897_v24 }
 0x795   :  { %v901_v25 = vpop.permute.xlu1 %900 }
 0x796   :  { %913 = vst.msk [vmem:[%s1520_s1 + $0x20] sm:$0x3] %vm912_vm6, %v901_v25 }
 0x799   :  { %v899_v11 = vpop.permute.xlu0 %898 }
 0x79a   :  { %911 = vst.msk [vmem:[%s1520_s1 + $0x18] sm:$0xff] %vm907_vm5, %v899_v11 }
 0x79b   :  { %918 = vsyncpa [#allocation3], 1 }

</bundles_post_ra>
